<compile_context>
chip_gen: v7x
topology: tpu7x:2x2x1
jax: 0.10.0
libtpu: 0.0.40
codegen_flags: <defaults>
</compile_context>

<pallas_src>
import math

import jax
import jax.numpy as jnp
from jax import lax
from jax.experimental import pallas as pl
from jax.experimental.pallas import tpu as pltpu

EPS = 1e-5  # torch.nn.LayerNorm default


# --------------------------------------------------------------------------- #
# Kernel
# --------------------------------------------------------------------------- #
def _patch_merging_kernel(x_ref, w_ref, bias_ref, o_ref):
    """Fused 2x2 merge + LayerNorm(4C) + Linear(4C->2C) on a block of tokens.

    x_ref:    (rb, 2, W/2, 2C)  one contiguous block of rb output-row pairs
                                (dim 1 = h-parity, last dim = (w-parity, C)).
    w_ref:    (4C, 2C)          gamma-folded, row-permuted reduction weight.
    bias_ref: (1, 2C) f32       equals beta @ W.
    o_ref:    (rb*W/2, 2C)      flattened tokens (sublane/lane-dense store).
    """
    rb, _, w2, c2 = x_ref.shape          # c2 = 2C
    n = rb * w2
    inv_4c = 1.0 / (2.0 * c2)            # 1 / 4C

    # Even-h / odd-h halves of every output token's 4C feature vector.
    # Cast to f32 BEFORE flattening so the sublane granule is 8 (not 16);
    # the (rb, W/2, 2C) -> (rb*W/2, 2C) collapse is layout-free whenever
    # W/2 is a multiple of 8 (true for the shapes exercised below).
    # TODO(synk): for Swin stages with W/2 = 28/14/7 this collapse still costs
    # a VMEM relayout; removing it needs W padding or a rank-3 dot path.
    xe = x_ref[:, 0].astype(jnp.float32).reshape(n, c2)
    xo = x_ref[:, 1].astype(jnp.float32).reshape(n, c2)

    # Exact f32 LayerNorm statistics over the full 4C vector (two-pass var).
    mean = (jnp.sum(xe, axis=-1, keepdims=True)
            + jnp.sum(xo, axis=-1, keepdims=True)) * inv_4c
    de = xe - mean
    do = xo - mean
    var = (jnp.sum(de * de, axis=-1, keepdims=True)
           + jnp.sum(do * do, axis=-1, keepdims=True)) * inv_4c
    rstd = lax.rsqrt(var + EPS)

    # Normalize, cast to the MXU operand dtype, and contract ONCE over K=4C so
    # the MXU accumulates both halves internally (no full-width f32 VPU add).
    mm_dtype = w_ref.dtype
    nx = jnp.concatenate([(de * rstd).astype(mm_dtype),
                          (do * rstd).astype(mm_dtype)], axis=-1)   # (n, 4C)
    y = jnp.dot(nx, w_ref[...], preferred_element_type=jnp.float32)
    o_ref[...] = (y + bias_ref[...]).astype(o_ref.dtype)


# --------------------------------------------------------------------------- #
# Generation-aware sizing helpers
# --------------------------------------------------------------------------- #
def _tpu_caps():
    """Returns (per-core VMEM bytes, #TensorCores sharing the parallel axis)."""
    vmem_bytes = 64 * 1024 * 1024        # conservative default (v7x per-core)
    n_cores = 1
    try:
        info = pltpu.get_tpu_info()
        vmem_bytes = int(getattr(info, "vmem_capacity_bytes", vmem_bytes))
    except Exception:
        pass
    try:
        kind = jax.devices()[0].device_kind.lower()
        if "v7" in kind or "7x" in kind:   # 2 TensorCores per chip
            n_cores = 2
    except Exception:
        pass
    return vmem_bytes, n_cores


def _fixed_vmem(c, mm_bytes):
    c4, c_out = 4 * c, 2 * c
    return 2 * (c4 * c_out * mm_bytes + c_out * 4)       # weight + bias (x2)


def _vmem_per_token(c, in_bytes, out_bytes, mm_bytes):
    c4, c_out = 4 * c, 2 * c
    io = 2 * (c4 * in_bytes + c_out * out_bytes)          # double-buffered I/O
    tmp = 2 * (c4 * 4) + c4 * mm_bytes + c_out * 4        # xe/xo+de/do f32, nx, y
    return io + tmp


def _pick_block_rows(bh2, w2, c, in_bytes, out_bytes, mm_bytes,
                     vmem_bytes, n_cores, out_sublane):
    """Largest row-pair block that fits VMEM, respects output sublane tiling,
    and (on multi-TensorCore chips) yields an even, balanced grid."""
    per_tok = _vmem_per_token(c, in_bytes, out_bytes, mm_bytes)
    fixed = _fixed_vmem(c, mm_bytes)
    budget = max(int(vmem_bytes * 0.7) - fixed, per_tok * w2)
    max_tokens = 8192 if n_cores <= 1 else 4096
    cap_rows = max(1, min(bh2, min(max_tokens, budget // per_tok) // w2))

    def aligned(br):   # flattened (br*W/2, 2C) output block must be tileable
        return br >= bh2 or (br * w2) % out_sublane == 0

    cands = [br for br in range(1, cap_rows + 1) if aligned(br)]
    if not cands:
        step = out_sublane // math.gcd(out_sublane, w2)
        cands = [min(bh2, step)]

    if n_cores <= 1:
        return max(cands)   # single TensorCore: biggest tile, no forced split

    best_key, best = (-1, -1), cands[0]
    for br in cands:
        g = -(-bh2 // br)
        score = (2 if g % n_cores == 0 else 0) + (1 if g >= 2 * n_cores else 0)
        if (score, br) > best_key:
            best_key, best = (score, br), br
    return best


# --------------------------------------------------------------------------- #
# Wrapper
# --------------------------------------------------------------------------- #
def patch_merging_forward(x, gamma, beta, w_red, *, input_resolution,
                          block_rows=None, interpret=False):
    """x: (B, H*W, C); gamma/beta: (4C,); w_red: (4C, 2C) -> (B, H*W//4, 2C)."""
    h, w = input_resolution
    b, seq_len, c = x.shape
    assert seq_len == h * w, "input feature has wrong size"
    assert h % 2 == 0 and w % 2 == 0, f"x size ({h}*{w}) are not even."
    assert w_red.shape == (4 * c, 2 * c)
    assert gamma.shape == (4 * c,) and beta.shape == (4 * c,)

    h2, w2 = h // 2, w // 2
    c2, c4, c_out = 2 * c, 4 * c, 2 * c
    bh2 = b * h2

    # Free contiguous reshape: dim0 = (b, i) output-row index, dim1 = h-parity,
    # dim2 = output column j, dim3 = contiguous (w-parity, channel) pair = 2C.
    xr = x.reshape(bh2, 2, w2, c2)

    # Fold the LayerNorm affine into the linear (exact algebra):
    #   (normalize(x)*gamma + beta) @ W == normalize(x) @ (gamma[:,None]*W) + beta@W
    w_f32 = w_red.astype(jnp.float32)
    w_fold = gamma.astype(jnp.float32)[:, None] * w_f32             # (4C, 2C)
    bias = (beta.astype(jnp.float32) @ w_f32).reshape(1, c_out)      # (1, 2C)

    # Kernel token channel order is the natural memory order [x0, x2 | x1, x3];
    # permute the weight rows to match (LN stats are permutation invariant).
    w_perm = jnp.concatenate([w_fold[0:c], w_fold[2 * c:3 * c],
                              w_fold[c:2 * c], w_fold[3 * c:4 * c]], axis=0)
    mm_dtype = x.dtype                      # bf16 in -> bf16 MXU operands
    w_all = w_perm.astype(mm_dtype)         # (4C, 2C)

    vmem_bytes, n_cores = _tpu_caps()
    in_bytes = x.dtype.itemsize
    out_bytes = x.dtype.itemsize
    mm_bytes = jnp.dtype(mm_dtype).itemsize
    out_sublane = max(8, 32 // out_bytes)   # 8 for f32 stores, 16 for bf16
    if block_rows is None:
        block_rows = _pick_block_rows(bh2, w2, c, in_bytes, out_bytes, mm_bytes,
                                      vmem_bytes, n_cores, out_sublane)
    block_rows = min(int(block_rows), bh2)
    n_block = block_rows * w2
    assert block_rows == bh2 or n_block % out_sublane == 0, \
        "block_rows * W/2 must be a multiple of the output sublane tile"
    grid = (int(-(-bh2 // block_rows)),)    # cdiv grid; tail block is masked

    x_spec = pl.BlockSpec((block_rows, 2, w2, c2), lambda i: (i, 0, 0, 0))
    w_spec = pl.BlockSpec((c4, c_out), lambda i: (0, 0))
    b_spec = pl.BlockSpec((1, c_out), lambda i: (0, 0))
    o_spec = pl.BlockSpec((n_block, c_out), lambda i: (i, 0))

    needed = (_fixed_vmem(c, mm_bytes)
              + n_block * _vmem_per_token(c, in_bytes, out_bytes, mm_bytes)
              + (4 << 20))
    vmem_limit = int(min(max(needed, 32 << 20), int(vmem_bytes * 0.9)))

    out = pl.pallas_call(
        _patch_merging_kernel,
        out_shape=jax.ShapeDtypeStruct((bh2 * w2, c_out), x.dtype),
        grid_spec=pltpu.PrefetchScalarGridSpec(
            num_scalar_prefetch=0,
            grid=grid,
            in_specs=[x_spec, w_spec, b_spec],
            out_specs=o_spec,
        ),
        compiler_params=pltpu.CompilerParams(
            dimension_semantics=("parallel",),
            vmem_limit_bytes=vmem_limit,
        ),
        interpret=interpret,
    )(xr, w_all, bias)

    # Lane-dense 2-D result -> (B, H/2*W/2, 2C); this reshape is free.
    return out.reshape(b, h2 * w2, c_out)


# --------------------------------------------------------------------------- #
# Pure-JAX reference (mirrors the PyTorch module)
# --------------------------------------------------------------------------- #
def _reference(x, gamma, beta, w_red, input_resolution):
    h, w = input_resolution
    b, _, c = x.shape
    xg = x.reshape(b, h, w, c)
    x0 = xg[:, 0::2, 0::2, :]
    x1 = xg[:, 1::2, 0::2, :]
    x2 = xg[:, 0::2, 1::2, :]
    x3 = xg[:, 1::2, 1::2, :]
    xm = jnp.concatenate([x0, x1, x2, x3], axis=-1).reshape(b, -1, 4 * c)
    mean = jnp.mean(xm, axis=-1, keepdims=True)
    var = jnp.mean((xm - mean) ** 2, axis=-1, keepdims=True)
    xn = (xm - mean) / jnp.sqrt(var + EPS) * gamma + beta
    return jnp.einsum("bnk,km->bnm", xn, w_red)


if __name__ == "__main__":
    # Small config consistent with the module: input_resolution=(16,16), dim=4.
    B, H, W, DIM = 2, 16, 16, 4
    key = jax.random.PRNGKey(0)
    kx, kw, kg, kb = jax.random.split(key, 4)

    x = jax.random.normal(kx, (B, H * W, DIM), dtype=jnp.float32)
    # nn.Linear(4*dim, 2*dim, bias=False) weight as (in, out) = (4C, 2C);
    # nn.LayerNorm(4*dim) affine parameters.
    w_red = jax.random.normal(kw, (4 * DIM, 2 * DIM), dtype=jnp.float32) * 0.1
    gamma = 1.0 + 0.05 * jax.random.normal(kg, (4 * DIM,), dtype=jnp.float32)
    beta = 0.05 * jax.random.normal(kb, (4 * DIM,), dtype=jnp.float32)

    ref = _reference(x, gamma, beta, w_red, (H, W))

    # 1) f32, auto tile size (matches the PyTorch module numerics).
    out = jax.block_until_ready(
        patch_merging_forward(x, gamma, beta, w_red, input_resolution=(H, W)))
    assert out.shape == (B, H * W // 4, 2 * DIM), out.shape
    assert jnp.allclose(out, ref, atol=1e-4, rtol=1e-4), \
        float(jnp.max(jnp.abs(out - ref)))

    # 2) f32, forced NON-DIVISOR tile -> exercises the cdiv grid + masked tail.
    out_t = jax.block_until_ready(
        patch_merging_forward(x, gamma, beta, w_red, input_resolution=(H, W),
                              block_rows=3))
    assert jnp.allclose(out_t, ref, atol=1e-4, rtol=1e-4), \
        float(jnp.max(jnp.abs(out_t - ref)))

    # 3) bf16 activations: bf16 MXU operands, f32 stats + f32 accumulation.
    x_bf = x.astype(jnp.bfloat16)
    out_bf = jax.block_until_ready(
        patch_merging_forward(x_bf, gamma, beta, w_red, input_resolution=(H, W)))
    assert out_bf.dtype == jnp.bfloat16
    ref_bf = _reference(x_bf.astype(jnp.float32), gamma, beta, w_red, (H, W))
    assert jnp.allclose(out_bf.astype(jnp.float32), ref_bf, atol=1e-1, rtol=1e-1), \
        float(jnp.max(jnp.abs(out_bf.astype(jnp.float32) - ref_bf)))

    print("KERNEL_OK")
</pallas_src>

<mosaic_0001>
module attributes {stable_mosaic.version = 11 : i64} {
  func.func @_patch_merging_kernel(%arg0: i32, %arg1: memref<16x2x8x8xf32, #tpu.memory_space<vmem>>, %arg2: memref<16x8xf32, #tpu.memory_space<vmem>>, %arg3: memref<1x8xf32, #tpu.memory_space<vmem>>, %arg4: memref<128x8xf32, #tpu.memory_space<vmem>>) attributes {dimension_semantics = [#tpu.dimension_semantics<parallel>], iteration_bounds = array<i64: 1>, scalar_prefetch = 0 : i64, scratch_operands = 0 : i64, tpu.core_type = #tpu.core_type<tc>, window_params = [{transform_indices = @transform_0, window_bounds = array<i64: 16, 2, 8, 8>}, {pipeline_mode = #tpu.pipeline_mode<synchronous>, transform_indices = @transform_1, window_bounds = array<i64: 16, 8>}, {pipeline_mode = #tpu.pipeline_mode<synchronous>, transform_indices = @transform_2, window_bounds = array<i64: 1, 8>}, {transform_indices = @transform_3, window_bounds = array<i64: 128, 8>}]} {
    %c0 = arith.constant 0 : index
    %c0_0 = arith.constant 0 : index
    %c0_1 = arith.constant 0 : index
    %c0_2 = arith.constant 0 : index
    %0 = vector.load %arg1[%c0, %c0_0, %c0_1, %c0_2] : memref<16x2x8x8xf32, #tpu.memory_space<vmem>>, vector<16x1x8x8xf32>
    %1 = vector.shape_cast %0 : vector<16x1x8x8xf32> to vector<16x8x8xf32>
    %2 = vector.shape_cast %1 : vector<16x8x8xf32> to vector<128x8xf32>
    %c0_3 = arith.constant 0 : index
    %c1 = arith.constant 1 : index
    %c0_4 = arith.constant 0 : index
    %c0_5 = arith.constant 0 : index
    %3 = vector.load %arg1[%c0_3, %c1, %c0_4, %c0_5] : memref<16x2x8x8xf32, #tpu.memory_space<vmem>>, vector<16x1x8x8xf32>
    %4 = vector.shape_cast %3 : vector<16x1x8x8xf32> to vector<16x8x8xf32>
    %5 = vector.shape_cast %4 : vector<16x8x8xf32> to vector<128x8xf32>
    %cst = arith.constant dense<0.000000e+00> : vector<128xf32>
    %6 = vector.multi_reduction <add>, %2, %cst [1] : vector<128x8xf32> to vector<128xf32>
    %7 = vector.shape_cast %6 : vector<128xf32> to vector<128x1xf32>
    %cst_6 = arith.constant dense<0.000000e+00> : vector<128xf32>
    %8 = vector.multi_reduction <add>, %5, %cst_6 [1] : vector<128x8xf32> to vector<128xf32>
    %9 = vector.shape_cast %8 : vector<128xf32> to vector<128x1xf32>
    %10 = arith.addf %7, %9 : vector<128x1xf32>
    %cst_7 = arith.constant 6.250000e-02 : f32
    %11 = vector.broadcast %cst_7 : f32 to vector<128x1xf32>
    %12 = arith.mulf %10, %11 : vector<128x1xf32>
    %13 = vector.broadcast %12 : vector<128x1xf32> to vector<128x8xf32>
    %14 = arith.subf %2, %13 : vector<128x8xf32>
    %15 = vector.broadcast %12 : vector<128x1xf32> to vector<128x8xf32>
    %16 = arith.subf %5, %15 : vector<128x8xf32>
    %17 = arith.mulf %14, %14 : vector<128x8xf32>
    %cst_8 = arith.constant dense<0.000000e+00> : vector<128xf32>
    %18 = vector.multi_reduction <add>, %17, %cst_8 [1] : vector<128x8xf32> to vector<128xf32>
    %19 = vector.shape_cast %18 : vector<128xf32> to vector<128x1xf32>
    %20 = arith.mulf %16, %16 : vector<128x8xf32>
    %cst_9 = arith.constant dense<0.000000e+00> : vector<128xf32>
    %21 = vector.multi_reduction <add>, %20, %cst_9 [1] : vector<128x8xf32> to vector<128xf32>
    %22 = vector.shape_cast %21 : vector<128xf32> to vector<128x1xf32>
    %23 = arith.addf %19, %22 : vector<128x1xf32>
    %cst_10 = arith.constant 6.250000e-02 : f32
    %24 = vector.broadcast %cst_10 : f32 to vector<128x1xf32>
    %25 = arith.mulf %23, %24 : vector<128x1xf32>
    %cst_11 = arith.constant 9.99999974E-6 : f32
    %26 = vector.broadcast %cst_11 : f32 to vector<128x1xf32>
    %27 = arith.addf %25, %26 : vector<128x1xf32>
    %28 = math.rsqrt %27 : vector<128x1xf32>
    %29 = vector.broadcast %28 : vector<128x1xf32> to vector<128x8xf32>
    %30 = arith.mulf %14, %29 : vector<128x8xf32>
    %31 = vector.broadcast %28 : vector<128x1xf32> to vector<128x8xf32>
    %32 = arith.mulf %16, %31 : vector<128x8xf32>
    %33 = tpu.concatenate %30, %32 in 1 : vector<128x8xf32>, vector<128x8xf32> -> vector<128x16xf32>
    %c0_12 = arith.constant 0 : index
    %c0_13 = arith.constant 0 : index
    %34 = vector.load %arg2[%c0_12, %c0_13] : memref<16x8xf32, #tpu.memory_space<vmem>>, vector<16x8xf32>
    %cst_14 = arith.constant dense<0.000000e+00> : vector<128x8xf32>
    %35 = tpu.matmul %33, %34, %cst_14 {dimension_numbers = #tpu.dot_dimension_numbers<[1], [0], [0], [1], [0, 0, 1, 1], [], []>} : vector<128x16xf32>, vector<16x8xf32>, vector<128x8xf32> -> vector<128x8xf32>
    %c0_15 = arith.constant 0 : index
    %c0_16 = arith.constant 0 : index
    %36 = vector.load %arg3[%c0_15, %c0_16] : memref<1x8xf32, #tpu.memory_space<vmem>>, vector<1x8xf32>
    %37 = vector.broadcast %36 : vector<1x8xf32> to vector<128x8xf32>
    %38 = arith.addf %35, %37 : vector<128x8xf32>
    %c0_17 = arith.constant 0 : index
    %c0_18 = arith.constant 0 : index
    %39 = vector.load %arg4[%c0_17, %c0_18] : memref<128x8xf32, #tpu.memory_space<vmem>>, vector<128x8xf32>
    tpu.vector_store %arg4[%c0_17, %c0_18], %38 {strides = array<i32>} : memref<128x8xf32, #tpu.memory_space<vmem>>, vector<128x8xf32>,
    return
  }
  func.func @transform_0(%arg0: i32) -> (i32, i32, i32, i32) {
    %c0_i32 = arith.constant 0 : i32
    %c0_i32_0 = arith.constant 0 : i32
    %c0_i32_1 = arith.constant 0 : i32
    %c0_i32_2 = arith.constant 0 : i32
    return %arg0, %c0_i32, %c0_i32_0, %c0_i32_1 : i32, i32, i32, i32
  }
  func.func @transform_1(%arg0: i32) -> (i32, i32) {
    %c0_i32 = arith.constant 0 : i32
    %c0_i32_0 = arith.constant 0 : i32
    %c0_i32_1 = arith.constant 0 : i32
    return %c0_i32, %c0_i32_0 : i32, i32
  }
  func.func @transform_2(%arg0: i32) -> (i32, i32) {
    %c0_i32 = arith.constant 0 : i32
    %c0_i32_0 = arith.constant 0 : i32
    %c0_i32_1 = arith.constant 0 : i32
    return %c0_i32, %c0_i32_0 : i32, i32
  }
  func.func @transform_3(%arg0: i32) -> (i32, i32) {
    %c0_i32 = arith.constant 0 : i32
    %c0_i32_0 = arith.constant 0 : i32
    return %arg0, %c0_i32 : i32, i32
  }
}

</mosaic_0001>

<bundles_post_ra>
// kernel: tpu_custom_call.1
= control target key start
LH: loop header
LB: loop body
LE: loop exit
PB: predicated region body
PF: predicated region fallthrough
CT: control target
= control target key end

     0   :  { %vm47_vm0 = vcmask 64512   ;;  %s853_s25 = smov 8   ;;  %vm521_vm1 = vcmask 130048   ;;  %s1499_s0 = inlined_call_operand.vmem [shape: f32[16,2,8,8], index: 0, kind: input, shape index: {}]   ;;  %s1500_s1 = inlined_call_operand.vmem [shape: f32[16,8], index: 1, kind: input, shape index: {}]   ;;  %s1501_s2 = inlined_call_operand.vmem [shape: f32[1,8], index: 2, kind: input, shape index: {}]   ;;  %s1502_s3 = inlined_call_operand.vmem [shape: f32[128,8], index: 3, kind: output, shape index: {}]  }
   0x1   :  { %v877_v0 = vld [vmem:[%s1499_s0 + $0x8] sm:$0xff]  ;;  %v882_v1 = vld [vmem:[%s1499_s0] sm:$0xff]  ;;  %v905_v8 = vld [vmem:[%s1499_s0 + $0x90] sm:$0xff] }
   0x2   :  { %v887_v2 = vld [vmem:[%s1499_s0 + $0x88] sm:$0xff]  ;;  %v96_v3 = vsel %vm47_vm0, %v877_v0, 0.0  ;;  %v48_v4 = vsel %vm47_vm0, %v882_v1, 0.0  ;;  %v896_v5 = vld [vmem:[%s1499_s0 + $0x80] sm:$0xff]  ;;  %v910_v9 = vld [vmem:[%s1499_s0 + $0x10] sm:$0xff]  ;;  %v75_v10 = vsel %vm47_vm0, %v905_v8, 0.0 }
   0x3   :  { %97 = vadd.xlane.f32.xlu1 %v96_v3  ;;  %49 = vadd.xlane.f32.xlu0 %v48_v4  ;;  %v120_v6 = vsel %vm47_vm0, %v887_v2, 0.0  ;;  %v72_v7 = vsel %vm47_vm0, %v896_v5, 0.0  ;;  %v51_v11 = vsel %vm47_vm0, %v910_v9, 0.0  ;;  %v919_v12 = vld [vmem:[%s1499_s0 + $0x98] sm:$0xff]  ;;  %v933_v16 = vld [vmem:[%s1499_s0 + $0xa0] sm:$0xff]  ;;  %v947_v20 = vld [vmem:[%s1499_s0 + $0xa8] sm:$0xff] }
   0x4   :  { %v924_v13 = vld [vmem:[%s1499_s0 + $0x18] sm:$0xff]  ;;  %v123_v14 = vsel %vm47_vm0, %v919_v12, 0.0  ;;  %v938_v17 = vld [vmem:[%s1499_s0 + $0x20] sm:$0xff]  ;;  %v78_v18 = vsel %vm47_vm0, %v933_v16, 0.0  ;;  %v952_v21 = vld [vmem:[%s1499_s0 + $0x28] sm:$0xff]  ;;  %v126_v22 = vsel %vm47_vm0, %v947_v20, 0.0 }
   0x5   :  { %v99_v15 = vsel %vm47_vm0, %v924_v13, 0.0  ;;  %v54_v19 = vsel %vm47_vm0, %v938_v17, 0.0  ;;  %v102_v23 = vsel %vm47_vm0, %v952_v21, 0.0  ;;  %v961_v24 = vld [vmem:[%s1499_s0 + $0xb0] sm:$0xff]  ;;  %v975_v28 = vld [vmem:[%s1499_s0 + $0xb8] sm:$0xff]  ;;  %v989_v32 = vld [vmem:[%s1499_s0 + $0xc0] sm:$0xff] }
   0x6   :  { %v966_v25 = vld [vmem:[%s1499_s0 + $0x30] sm:$0xff]  ;;  %v81_v26 = vsel %vm47_vm0, %v961_v24, 0.0  ;;  %v980_v29 = vld [vmem:[%s1499_s0 + $0x38] sm:$0xff]  ;;  %v129_v30 = vsel %vm47_vm0, %v975_v28, 0.0  ;;  %v994_v33 = vld [vmem:[%s1499_s0 + $0x40] sm:$0xff]  ;;  %v84_v34 = vsel %vm47_vm0, %v989_v32, 0.0 }
   0x7   :  { %121 = vadd.xlane.f32.xlu1 %v120_v6  ;;  %73 = vadd.xlane.f32.xlu0 %v72_v7  ;;  %v57_v27 = vsel %vm47_vm0, %v966_v25, 0.0  ;;  %v105_v31 = vsel %vm47_vm0, %v980_v29, 0.0  ;;  %v60_v35 = vsel %vm47_vm0, %v994_v33, 0.0  ;;  %v1003_v36 = vld [vmem:[%s1499_s0 + $0xc8] sm:$0xff]  ;;  %v1017_v40 = vld [vmem:[%s1499_s0 + $0xd0] sm:$0xff]  ;;  %v1031_v44 = vld [vmem:[%s1499_s0 + $0xd8] sm:$0xff] }
   0x8   :  { %v1008_v37 = vld [vmem:[%s1499_s0 + $0x48] sm:$0xff]  ;;  %v132_v38 = vsel %vm47_vm0, %v1003_v36, 0.0  ;;  %v1022_v41 = vld [vmem:[%s1499_s0 + $0x50] sm:$0xff]  ;;  %v87_v42 = vsel %vm47_vm0, %v1017_v40, 0.0  ;;  %v1036_v45 = vld [vmem:[%s1499_s0 + $0x58] sm:$0xff]  ;;  %v135_v46 = vsel %vm47_vm0, %v1031_v44, 0.0 }
   0x9   :  { %v108_v39 = vsel %vm47_vm0, %v1008_v37, 0.0  ;;  %v63_v43 = vsel %vm47_vm0, %v1022_v41, 0.0  ;;  %v111_v47 = vsel %vm47_vm0, %v1036_v45, 0.0  ;;  %v1045_v48 = vld [vmem:[%s1499_s0 + $0xe0] sm:$0xff]  ;;  %v1059_v52 = vld [vmem:[%s1499_s0 + $0xe8] sm:$0xff]  ;;  %v1073_v56 = vld [vmem:[%s1499_s0 + $0xf0] sm:$0xff] }
   0xa   :  { %v1050_v49 = vld [vmem:[%s1499_s0 + $0x60] sm:$0xff]  ;;  %v90_v50 = vsel %vm47_vm0, %v1045_v48, 0.0  ;;  %v1064_v53 = vld [vmem:[%s1499_s0 + $0x68] sm:$0xff]  ;;  %v138_v54 = vsel %vm47_vm0, %v1059_v52, 0.0  ;;  %v1078_v57 = vld [vmem:[%s1499_s0 + $0x70] sm:$0xff]  ;;  %v93_v58 = vsel %vm47_vm0, %v1073_v56, 0.0 }
   0xb   :  { %76 = vadd.xlane.f32.xlu1 %v75_v10  ;;  %52 = vadd.xlane.f32.xlu0 %v51_v11  ;;  %v66_v51 = vsel %vm47_vm0, %v1050_v49, 0.0  ;;  %v114_v55 = vsel %vm47_vm0, %v1064_v53, 0.0  ;;  %v69_v59 = vsel %vm47_vm0, %v1078_v57, 0.0  ;;  %v1087_v60 = vld [vmem:[%s1499_s0 + $0xf8] sm:$0xff] }
   0xc   :  { %v1092_v61 = vld [vmem:[%s1499_s0 + $0x78] sm:$0xff]  ;;  %v141_v62 = vsel %vm47_vm0, %v1087_v60, 0.0 }
   0xd   :  { %v117_v63 = vsel %vm47_vm0, %v1092_v61, 0.0 }
   0xf   :  { %124 = vadd.xlane.f32.xlu1 %v123_v14  ;;  %100 = vadd.xlane.f32.xlu0 %v99_v15 }
  0x13   :  { %79 = vadd.xlane.f32.xlu1 %v78_v18  ;;  %55 = vadd.xlane.f32.xlu0 %v54_v19 }
  0x17   :  { %127 = vadd.xlane.f32.xlu1 %v126_v22  ;;  %103 = vadd.xlane.f32.xlu0 %v102_v23 }
  0x1b   :  { %82 = vadd.xlane.f32.xlu1 %v81_v26  ;;  %58 = vadd.xlane.f32.xlu0 %v57_v27 }
  0x1f   :  { %130 = vadd.xlane.f32.xlu1 %v129_v30  ;;  %106 = vadd.xlane.f32.xlu0 %v105_v31 }
  0x23   :  { %85 = vadd.xlane.f32.xlu1 %v84_v34  ;;  %61 = vadd.xlane.f32.xlu0 %v60_v35 }
  0x27   :  { %133 = vadd.xlane.f32.xlu1 %v132_v38  ;;  %109 = vadd.xlane.f32.xlu0 %v108_v39 }
  0x2b   :  { %88 = vadd.xlane.f32.xlu1 %v87_v42  ;;  %64 = vadd.xlane.f32.xlu0 %v63_v43 }
  0x2f   :  { %136 = vadd.xlane.f32.xlu1 %v135_v46  ;;  %112 = vadd.xlane.f32.xlu0 %v111_v47 }
  0x33   :  { %91 = vadd.xlane.f32.xlu1 %v90_v50  ;;  %67 = vadd.xlane.f32.xlu0 %v66_v51 }
  0x37   :  { %139 = vadd.xlane.f32.xlu1 %v138_v54  ;;  %115 = vadd.xlane.f32.xlu0 %v114_v55 }
  0x3b   :  { %94 = vadd.xlane.f32.xlu1 %v93_v58  ;;  %70 = vadd.xlane.f32.xlu0 %v69_v59 }
  0x3f   :  { %142 = vadd.xlane.f32.xlu1 %v141_v62  ;;  %118 = vadd.xlane.f32.xlu0 %v117_v63 }
  0x90   :  { %v98_v3 = vpop.xlane.xlu1 %97  ;;  %v50_v4 = vpop.xlane.xlu0 %49 }
  0x91   :  { %v144_v6 = vadd.f32 %v98_v3, %v50_v4 }
  0x93   :  { %v160_v7 = vmul.f32 0.0625, %v144_v6 }
  0x94   :  { %v122_v10 = vpop.xlane.xlu1 %121  ;;  %v74_v11 = vpop.xlane.xlu0 %73 }
  0x95   :  { %v1099_v14 = vsub.f32 %v882_v1, %v160_v7  ;;  %v1102_v15 = vsub.f32 %v877_v0, %v160_v7  ;;  %v152_v18 = vadd.f32 %v122_v10, %v74_v11 }
  0x97   :  { %v168_v19 = vmul.f32 0.0625, %v152_v18  ;;  %v208_v22 = vmul.f32 %v1099_v14, %v1099_v14  ;;  %v272_v1 = vmul.f32 %v1102_v15, %v1102_v15 }
  0x98   :  { %v77_v23 = vpop.xlane.xlu1 %76  ;;  %v53_v26 = vpop.xlane.xlu0 %52 }
  0x99   :  { %v1107_v27 = vsub.f32 %v896_v5, %v168_v19  ;;  %v1110_v30 = vsub.f32 %v887_v2, %v168_v19  ;;  %v224_v31 = vsel %vm47_vm0, %v208_v22, 0.0  ;;  %v288_v42 = vsel %vm47_vm0, %v272_v1, 0.0 }
  0x9a   :  { %225 = vadd.xlane.f32.xlu0 %v224_v31 }
  0x9b   :  { %v216_v0 = vmul.f32 %v1107_v27, %v1107_v27  ;;  %v280_v38 = vmul.f32 %v1110_v30, %v1110_v30 }
  0x9c   :  { %v125_v34 = vpop.xlane.xlu1 %124  ;;  %v101_v35 = vpop.xlane.xlu0 %100 }
  0x9d   :  { %v153_v39 = vadd.f32 %v125_v34, %v77_v23  ;;  %v145_v5 = vadd.f32 %v101_v35, %v53_v26  ;;  %v248_v2 = vsel %vm47_vm0, %v216_v0, 0.0  ;;  %v312_v51 = vsel %vm47_vm0, %v280_v38, 0.0 }
  0x9e   :  { %289 = vadd.xlane.f32.xlu0 %v288_v42  ;;  %249 = vadd.xlane.f32.xlu1 %v248_v2 }
  0x9f   :  { %v169_v43 = vmul.f32 0.0625, %v153_v39  ;;  %v161_v46 = vmul.f32 0.0625, %v145_v5 }
  0xa0   :  { %v80_v47 = vpop.xlane.xlu1 %79  ;;  %v56_v50 = vpop.xlane.xlu0 %55 }
  0xa1   :  { %v1123_v54 = vsub.f32 %v905_v8, %v169_v43  ;;  %v1126_v55 = vsub.f32 %v919_v12, %v169_v43  ;;  %v1129_v58 = vsub.f32 %v910_v9, %v161_v46  ;;  %v1132_v59 = vsub.f32 %v924_v13, %v161_v46 }
  0xa2   :  { %313 = vadd.xlane.f32.xlu1 %v312_v51 }
  0xa3   :  { %v217_v62 = vmul.f32 %v1123_v54, %v1123_v54  ;;  %v209_v63 = vmul.f32 %v1129_v58, %v1129_v58  ;;  %v281_v8 = vmul.f32 %v1126_v55, %v1126_v55  ;;  %v273_v12 = vmul.f32 %v1132_v59, %v1132_v59 }
  0xa4   :  { %v128_v3 = vpop.xlane.xlu1 %127  ;;  %v104_v4 = vpop.xlane.xlu0 %103 }
  0xa5   :  { %v154_v9 = vadd.f32 %v128_v3, %v80_v47  ;;  %v146_v6 = vadd.f32 %v104_v4, %v56_v50  ;;  %v251_v13 = vsel %vm47_vm0, %v217_v62, 0.0  ;;  %v227_v7 = vsel %vm47_vm0, %v209_v63, 0.0 }
  0xa6   :  { %252 = vadd.xlane.f32.xlu1 %v251_v13  ;;  %228 = vadd.xlane.f32.xlu0 %v227_v7  ;;  %v315_v22 = vsel %vm47_vm0, %v281_v8, 0.0  ;;  %v291_v23 = vsel %vm47_vm0, %v273_v12, 0.0 }
  0xa7   :  { %v170_v10 = vmul.f32 0.0625, %v154_v9  ;;  %v162_v11 = vmul.f32 0.0625, %v146_v6 }
  0xa8   :  { %v83_v18 = vpop.xlane.xlu1 %82  ;;  %v59_v19 = vpop.xlane.xlu0 %58 }
  0xa9   :  { %v1147_v26 = vsub.f32 %v933_v16, %v170_v10  ;;  %v1150_v31 = vsub.f32 %v947_v20, %v170_v10  ;;  %v1153_v1 = vsub.f32 %v938_v17, %v162_v11  ;;  %v1156_v0 = vsub.f32 %v952_v21, %v162_v11 }
  0xaa   :  { %316 = vadd.xlane.f32.xlu1 %v315_v22  ;;  %292 = vadd.xlane.f32.xlu0 %v291_v23 }
  0xab   :  { %v218_v34 = vmul.f32 %v1147_v26, %v1147_v26  ;;  %v210_v35 = vmul.f32 %v1153_v1, %v1153_v1  ;;  %v282_v20 = vmul.f32 %v1150_v31, %v1150_v31  ;;  %v274_v17 = vmul.f32 %v1156_v0, %v1156_v0 }
  0xac   :  { %v131_v38 = vpop.xlane.xlu1 %130  ;;  %v107_v16 = vpop.xlane.xlu0 %106 }
  0xad   :  { %v155_v39 = vadd.f32 %v131_v38, %v83_v18  ;;  %v147_v5 = vadd.f32 %v107_v16, %v59_v19  ;;  %v254_v21 = vsel %vm47_vm0, %v218_v34, 0.0  ;;  %v230_v42 = vsel %vm47_vm0, %v210_v35, 0.0 }
  0xae   :  { %255 = vadd.xlane.f32.xlu1 %v254_v21  ;;  %231 = vadd.xlane.f32.xlu0 %v230_v42  ;;  %v318_v50 = vsel %vm47_vm0, %v282_v20, 0.0  ;;  %v294_v51 = vsel %vm47_vm0, %v274_v17, 0.0 }
  0xaf   :  { %v171_v2 = vmul.f32 0.0625, %v155_v39  ;;  %v163_v43 = vmul.f32 0.0625, %v147_v5 }
  0xb0   :  { %v86_v46 = vpop.xlane.xlu1 %85  ;;  %v62_v47 = vpop.xlane.xlu0 %61 }
  0xb1   :  { %v1171_v62 = vsub.f32 %v961_v24, %v171_v2  ;;  %v1174_v63 = vsub.f32 %v975_v28, %v171_v2  ;;  %v1177_v3 = vsub.f32 %v966_v25, %v163_v43  ;;  %v1180_v4 = vsub.f32 %v980_v29, %v163_v43 }
  0xb2   :  { %319 = vadd.xlane.f32.xlu1 %v318_v50  ;;  %295 = vadd.xlane.f32.xlu0 %v294_v51 }
  0xb3   :  { %v219_v8 = vmul.f32 %v1171_v62, %v1171_v62  ;;  %v211_v12 = vmul.f32 %v1177_v3, %v1177_v3  ;;  %v283_v28 = vmul.f32 %v1174_v63, %v1174_v63  ;;  %v275_v25 = vmul.f32 %v1180_v4, %v1180_v4 }
  0xb4   :  { %v134_v9 = vpop.xlane.xlu1 %133  ;;  %v110_v24 = vpop.xlane.xlu0 %109 }
  0xb5   :  { %v156_v6 = vadd.f32 %v134_v9, %v86_v46  ;;  %v148_v13 = vadd.f32 %v110_v24, %v62_v47  ;;  %v257_v29 = vsel %vm47_vm0, %v219_v8, 0.0  ;;  %v233_v7 = vsel %vm47_vm0, %v211_v12, 0.0 }
  0xb6   :  { %258 = vadd.xlane.f32.xlu1 %v257_v29  ;;  %234 = vadd.xlane.f32.xlu0 %v233_v7  ;;  %v321_v22 = vsel %vm47_vm0, %v283_v28, 0.0  ;;  %v297_v23 = vsel %vm47_vm0, %v275_v25, 0.0 }
  0xb7   :  { %v172_v10 = vmul.f32 0.0625, %v156_v6  ;;  %v164_v11 = vmul.f32 0.0625, %v148_v13 }
  0xb8   :  { %v89_v18 = vpop.xlane.xlu1 %88  ;;  %v65_v19 = vpop.xlane.xlu0 %64 }
  0xb9   :  { %v1195_v34 = vsub.f32 %v989_v32, %v172_v10  ;;  %v1198_v35 = vsub.f32 %v1003_v36, %v172_v10  ;;  %v1201_v38 = vsub.f32 %v994_v33, %v164_v11  ;;  %v1204_v16 = vsub.f32 %v1008_v37, %v164_v11 }
  0xba   :  { %322 = vadd.xlane.f32.xlu1 %v321_v22  ;;  %298 = vadd.xlane.f32.xlu0 %v297_v23 }
  0xbb   :  { %v220_v20 = vmul.f32 %v1195_v34, %v1195_v34  ;;  %v212_v17 = vmul.f32 %v1201_v38, %v1201_v38  ;;  %v284_v36 = vmul.f32 %v1198_v35, %v1198_v35  ;;  %v276_v33 = vmul.f32 %v1204_v16, %v1204_v16 }
  0xbc   :  { %v137_v39 = vpop.xlane.xlu1 %136  ;;  %v113_v32 = vpop.xlane.xlu0 %112 }
  0xbd   :  { %v157_v5 = vadd.f32 %v137_v39, %v89_v18  ;;  %v149_v21 = vadd.f32 %v113_v32, %v65_v19  ;;  %v260_v37 = vsel %vm47_vm0, %v220_v20, 0.0  ;;  %v236_v42 = vsel %vm47_vm0, %v212_v17, 0.0 }
  0xbe   :  { %261 = vadd.xlane.f32.xlu1 %v260_v37  ;;  %237 = vadd.xlane.f32.xlu0 %v236_v42  ;;  %v324_v50 = vsel %vm47_vm0, %v284_v36, 0.0  ;;  %v300_v51 = vsel %vm47_vm0, %v276_v33, 0.0 }
  0xbf   :  { %v173_v2 = vmul.f32 0.0625, %v157_v5  ;;  %v165_v43 = vmul.f32 0.0625, %v149_v21 }
  0xc0   :  { %v92_v46 = vpop.xlane.xlu1 %91  ;;  %v68_v47 = vpop.xlane.xlu0 %67 }
  0xc1   :  { %v1219_v8 = vsub.f32 %v1017_v40, %v173_v2  ;;  %v1222_v12 = vsub.f32 %v1031_v44, %v173_v2  ;;  %v1225_v9 = vsub.f32 %v1022_v41, %v165_v43  ;;  %v1228_v24 = vsub.f32 %v1036_v45, %v165_v43 }
  0xc2   :  { %325 = vadd.xlane.f32.xlu1 %v324_v50  ;;  %301 = vadd.xlane.f32.xlu0 %v300_v51 }
  0xc3   :  { %v221_v28 = vmul.f32 %v1219_v8, %v1219_v8  ;;  %v213_v25 = vmul.f32 %v1225_v9, %v1225_v9  ;;  %v285_v44 = vmul.f32 %v1222_v12, %v1222_v12  ;;  %v277_v41 = vmul.f32 %v1228_v24, %v1228_v24 }
  0xc4   :  { %v140_v6 = vpop.xlane.xlu1 %139  ;;  %v116_v40 = vpop.xlane.xlu0 %115 }
  0xc5   :  { %v158_v13 = vadd.f32 %v140_v6, %v92_v46  ;;  %v150_v29 = vadd.f32 %v116_v40, %v68_v47  ;;  %v263_v45 = vsel %vm47_vm0, %v221_v28, 0.0  ;;  %v239_v7 = vsel %vm47_vm0, %v213_v25, 0.0 }
  0xc6   :  { %264 = vadd.xlane.f32.xlu1 %v263_v45  ;;  %240 = vadd.xlane.f32.xlu0 %v239_v7  ;;  %v327_v22 = vsel %vm47_vm0, %v285_v44, 0.0  ;;  %v303_v23 = vsel %vm47_vm0, %v277_v41, 0.0 }
  0xc7   :  { %v174_v10 = vmul.f32 0.0625, %v158_v13  ;;  %v166_v11 = vmul.f32 0.0625, %v150_v29 }
  0xc8   :  { %v95_v18 = vpop.xlane.xlu1 %94  ;;  %v71_v19 = vpop.xlane.xlu0 %70 }
  0xc9   :  { %v1243_v20 = vsub.f32 %v1045_v48, %v174_v10  ;;  %v1246_v17 = vsub.f32 %v1059_v52, %v174_v10  ;;  %v1249_v39 = vsub.f32 %v1050_v49, %v166_v11  ;;  %v1252_v32 = vsub.f32 %v1064_v53, %v166_v11 }
  0xca   :  { %328 = vadd.xlane.f32.xlu1 %v327_v22  ;;  %304 = vadd.xlane.f32.xlu0 %v303_v23 }
  0xcb   :  { %v222_v36 = vmul.f32 %v1243_v20, %v1243_v20  ;;  %v214_v33 = vmul.f32 %v1249_v39, %v1249_v39  ;;  %v286_v52 = vmul.f32 %v1246_v17, %v1246_v17  ;;  %v278_v49 = vmul.f32 %v1252_v32, %v1252_v32 }
  0xcc   :  { %v143_v5 = vpop.xlane.xlu1 %142  ;;  %v119_v48 = vpop.xlane.xlu0 %118 }
  0xcd   :  { %v159_v21 = vadd.f32 %v143_v5, %v95_v18  ;;  %v151_v37 = vadd.f32 %v119_v48, %v71_v19  ;;  %v266_v53 = vsel %vm47_vm0, %v222_v36, 0.0  ;;  %v242_v42 = vsel %vm47_vm0, %v214_v33, 0.0 }
  0xce   :  { %267 = vadd.xlane.f32.xlu1 %v266_v53  ;;  %243 = vadd.xlane.f32.xlu0 %v242_v42  ;;  %v330_v46 = vsel %vm47_vm0, %v286_v52, 0.0  ;;  %v306_v47 = vsel %vm47_vm0, %v278_v49, 0.0 }
  0xcf   :  { %v175_v2 = vmul.f32 0.0625, %v159_v21  ;;  %v167_v43 = vmul.f32 0.0625, %v151_v37  ;;  %v512_v21 = vld [vmem:[%s1500_s1] sm:$0xff]  ;;  %v513_v37 = vld [vmem:[%s1500_s1 + $0x8] sm:$0xff] }
  0xd0   :  { %v814_v53 = vpack.c.bf16 %v513_v37, %v512_v21 }
  0xd1   :  { %v1267_v50 = vsub.f32 %v1073_v56, %v175_v2  ;;  %v1270_v51 = vsub.f32 %v1087_v60, %v175_v2  ;;  %v1273_v28 = vsub.f32 %v1078_v57, %v167_v43  ;;  %v1276_v25 = vsub.f32 %v1092_v61, %v167_v43 }
  0xd2   :  { %331 = vadd.xlane.f32.xlu1 %v330_v46  ;;  %307 = vadd.xlane.f32.xlu0 %v306_v47 }
  0xd3   :  { %v223_v6 = vmul.f32 %v1267_v50, %v1267_v50  ;;  %v215_v40 = vmul.f32 %v1273_v28, %v1273_v28  ;;  %v287_v60 = vmul.f32 %v1270_v51, %v1270_v51  ;;  %v279_v57 = vmul.f32 %v1276_v25, %v1276_v25  ;;  %815 = vmatprep.subr.bf16.mxu0 %v814_v53 }
  0xd4   :  { %818 = vmatprep.subr.bf16.mxu1 %v814_v53  ;;  %817 = vmatpush3.bf16.msra.mxu0 %v814_v53 }
  0xd5   :  { %v269_v56 = vsel %vm47_vm0, %v223_v6, 0.0  ;;  %v245_v44 = vsel %vm47_vm0, %v215_v40, 0.0  ;;  %v333_v61 = vsel %vm47_vm0, %v287_v60, 0.0  ;;  %v309_v41 = vsel %vm47_vm0, %v279_v57, 0.0  ;;  %819 = vmatpush3.bf16.msra.mxu1 %v814_v53 }
  0xd6   :  { %270 = vadd.xlane.f32.xlu1 %v269_v56  ;;  %246 = vadd.xlane.f32.xlu0 %v245_v44 }
  0xda   :  { %334 = vadd.xlane.f32.xlu1 %v333_v61  ;;  %310 = vadd.xlane.f32.xlu0 %v309_v41 }
 0x127   :  { %v226_v13 = vpop.xlane.xlu0 %225 }
 0x12b   :  { %v250_v29 = vpop.xlane.xlu1 %249  ;;  %v290_v45 = vpop.xlane.xlu0 %289 }
 0x12c   :  { %v336_v7 = vadd.f32 %v290_v45, %v226_v13 }
 0x12e   :  { %v352_v10 = vmul.f32 0.0625, %v336_v7 }
 0x12f   :  { %v314_v11 = vpop.xlane.xlu1 %313 }
 0x130   :  { %v368_v18 = vadd.f32 1e-05, %v352_v10  ;;  %v344_v19 = vadd.f32 %v314_v11, %v250_v29 }
 0x132   :  { %821 = vrsqrt.f32 %v368_v18  ;;  %v360_v22 = vmul.f32 0.0625, %v344_v19 }
 0x133   :  { %v253_v23 = vpop.xlane.xlu1 %252  ;;  %v229_v36 = vpop.xlane.xlu0 %228 }
 0x134   :  { %v376_v33 = vadd.f32 1e-05, %v360_v22 }
 0x136   :  { %823 = vrsqrt.f32 %v376_v33 }
 0x137   :  { %v317_v5 = vpop.xlane.xlu1 %316  ;;  %v293_v48 = vpop.xlane.xlu0 %292 }
 0x138   :  { %v345_v52 = vadd.f32 %v317_v5, %v253_v23  ;;  %v337_v49 = vadd.f32 %v293_v48, %v229_v36 }
 0x13a   :  { %v361_v42 = vmul.f32 0.0625, %v345_v52  ;;  %v353_v2 = vmul.f32 0.0625, %v337_v49 }
 0x13b   :  { %v256_v43 = vpop.xlane.xlu1 %255  ;;  %v232_v46 = vpop.xlane.xlu0 %231 }
 0x13c   :  { %v1296_v47 = vpop.eup %821  ;;  %v369_v6 = vadd.f32 1e-05, %v353_v2  ;;  %v377_v40 = vadd.f32 1e-05, %v361_v42 }
 0x13d   :  { %v416_v56 = vmul.f32 %v1296_v47, %v1102_v15 }
 0x13e   :  { %825 = vrsqrt.f32 %v369_v6 }
 0x13f   :  { %v320_v44 = vpop.xlane.xlu1 %319  ;;  %448 = vrot.lane.b32.xlu0 %v416_v56, %s853_s25  ;;  %v296_v60 = vpop.xlane.xlu0 %295  ;;  %827 = vrsqrt.f32 %v377_v40 }
 0x140   :  { %v1301_v57 = vpop.eup %823  ;;  %v346_v61 = vadd.f32 %v320_v44, %v256_v43  ;;  %v338_v41 = vadd.f32 %v296_v60, %v232_v46 }
 0x141   :  { %v424_v13 = vmul.f32 %v1301_v57, %v1110_v30 }
 0x142   :  { %v362_v29 = vmul.f32 0.0625, %v346_v61  ;;  %v354_v45 = vmul.f32 0.0625, %v338_v41 }
 0x143   :  { %464 = vrot.lane.b32.xlu1 %v424_v13, %s853_s25  ;;  %v259_v7 = vpop.xlane.xlu1 %258  ;;  %v235_v15 = vpop.xlane.xlu0 %234 }
 0x144   :  { %v378_v10 = vadd.f32 1e-05, %v362_v29  ;;  %v370_v11 = vadd.f32 1e-05, %v354_v45 }
 0x146   :  { %829 = vrsqrt.f32 %v378_v10 }
 0x147   :  { %831 = vrsqrt.f32 %v370_v11  ;;  %v323_v18 = vpop.xlane.xlu1 %322  ;;  %v299_v19 = vpop.xlane.xlu0 %298 }
 0x148   :  { %v347_v22 = vadd.f32 %v323_v18, %v259_v7  ;;  %v339_v23 = vadd.f32 %v299_v19, %v235_v15  ;;  %v1306_v36 = vpop.eup %825 }
 0x149   :  { %v417_v30 = vmul.f32 %v1306_v36, %v1132_v59  ;;  %v1310_v48 = vpop.eup %827 }
 0x14a   :  { %v363_v33 = vmul.f32 0.0625, %v347_v22  ;;  %v355_v5 = vmul.f32 0.0625, %v339_v23  ;;  %v425_v53 = vmul.f32 %v1310_v48, %v1126_v55 }
 0x14b   :  { %v262_v52 = vpop.xlane.xlu1 %261  ;;  %v238_v49 = vpop.xlane.xlu0 %237  ;;  %450 = vrot.lane.b32.xlu1 %v417_v30, %s853_s25 }
 0x14c   :  { %v379_v21 = vadd.f32 1e-05, %v363_v33  ;;  %v371_v37 = vadd.f32 1e-05, %v355_v5 }
 0x14e   :  { %833 = vrsqrt.f32 %v379_v21 }
 0x14f   :  { %835 = vrsqrt.f32 %v371_v37  ;;  %v326_v42 = vpop.xlane.xlu1 %325  ;;  %v302_v2 = vpop.xlane.xlu0 %301  ;;  %466 = vrot.lane.b32.xlu1 %v425_v53, %s853_s25 }
 0x150   :  { %v1315_v43 = vpop.eup %829  ;;  %v348_v46 = vadd.f32 %v326_v42, %v262_v52  ;;  %v340_v59 = vadd.f32 %v302_v2, %v238_v49 }
 0x151   :  { %v1318_v6 = vpop.eup %831  ;;  %v426_v40 = vmul.f32 %v1315_v43, %v1150_v31 }
 0x152   :  { %v364_v56 = vmul.f32 0.0625, %v348_v46  ;;  %v356_v44 = vmul.f32 0.0625, %v340_v59  ;;  %v418_v60 = vmul.f32 %v1318_v6, %v1156_v0 }
 0x153   :  { %v265_v55 = vpop.xlane.xlu1 %264  ;;  %v241_v61 = vpop.xlane.xlu0 %240  ;;  %468 = vrot.lane.b32.xlu1 %v426_v40, %s853_s25 }
 0x154   :  { %v380_v41 = vadd.f32 1e-05, %v364_v56  ;;  %v372_v13 = vadd.f32 1e-05, %v356_v44  ;;  %452 = vrot.lane.b32.xlu0 %v418_v60, %s853_s25 }
 0x156   :  { %837 = vrsqrt.f32 %v380_v41 }
 0x157   :  { %839 = vrsqrt.f32 %v372_v13  ;;  %v329_v29 = vpop.xlane.xlu1 %328  ;;  %v305_v45 = vpop.xlane.xlu0 %304 }
 0x158   :  { %v1326_v7 = vpop.eup %833  ;;  %v349_v31 = vadd.f32 %v329_v29, %v265_v55  ;;  %v341_v15 = vadd.f32 %v305_v45, %v241_v61 }
 0x159   :  { %v1328_v10 = vpop.eup %835  ;;  %v427_v0 = vmul.f32 %v1326_v7, %v1174_v63 }
 0x15a   :  { %v365_v11 = vmul.f32 0.0625, %v349_v31  ;;  %v357_v18 = vmul.f32 0.0625, %v341_v15  ;;  %v419_v19 = vmul.f32 %v1328_v10, %v1180_v4 }
 0x15b   :  { %v268_v22 = vpop.xlane.xlu1 %267  ;;  %470 = vrot.lane.b32.xlu1 %v427_v0, %s853_s25  ;;  %v244_v23 = vpop.xlane.xlu0 %243 }
 0x15c   :  { %v381_v33 = vadd.f32 1e-05, %v365_v11  ;;  %v373_v5 = vadd.f32 1e-05, %v357_v18  ;;  %454 = vrot.lane.b32.xlu0 %v419_v19, %s853_s25 }
 0x15e   :  { %841 = vrsqrt.f32 %v381_v33 }
 0x15f   :  { %843 = vrsqrt.f32 %v373_v5  ;;  %v332_v30 = vpop.xlane.xlu1 %331  ;;  %v308_v52 = vpop.xlane.xlu0 %307  ;;  %v408_v5 = vmul.f32 %v1301_v57, %v1107_v27  ;;  %v410_v27 = vmul.f32 %v1315_v43, %v1147_v26  ;;  %v402_v57 = vmul.f32 %v1318_v6, %v1153_v1 }
 0x160   :  { %v1336_v49 = vpop.eup %837  ;;  %v350_v63 = vadd.f32 %v332_v30, %v268_v22  ;;  %v342_v21 = vadd.f32 %v308_v52, %v244_v23  ;;  %v403_v26 = vmul.f32 %v1328_v10, %v1177_v3 }
 0x161   :  { %v1338_v37 = vpop.eup %839  ;;  %v428_v4 = vmul.f32 %v1336_v49, %v1198_v35 }
 0x162   :  { %v366_v53 = vmul.f32 0.0625, %v350_v63  ;;  %v358_v42 = vmul.f32 0.0625, %v342_v21  ;;  %v420_v2 = vmul.f32 %v1338_v37, %v1204_v16 }
 0x163   :  { %v271_v46 = vpop.xlane.xlu1 %270  ;;  %472 = vrot.lane.b32.xlu1 %v428_v4, %s853_s25  ;;  %v247_v59 = vpop.xlane.xlu0 %246 }
 0x164   :  { %v382_v40 = vadd.f32 1e-05, %v366_v53  ;;  %v374_v56 = vadd.f32 1e-05, %v358_v42  ;;  %456 = vrot.lane.b32.xlu0 %v420_v2, %s853_s25  ;;  %v412_v42 = vmul.f32 %v1336_v49, %v1195_v34 }
 0x166   :  { %845 = vrsqrt.f32 %v382_v40 }
 0x167   :  { %847 = vrsqrt.f32 %v374_v56  ;;  %v335_v44 = vpop.xlane.xlu1 %334  ;;  %v311_v60 = vpop.xlane.xlu0 %310 }
 0x168   :  { %v1346_v55 = vpop.eup %841  ;;  %v351_v35 = vadd.f32 %v335_v44, %v271_v46  ;;  %v343_v61 = vadd.f32 %v311_v60, %v247_v59 }
 0x169   :  { %v1348_v41 = vpop.eup %843  ;;  %v429_v16 = vmul.f32 %v1346_v55, %v1222_v12  ;;  %v413_v10 = vmul.f32 %v1346_v55, %v1219_v8 }
 0x16a   :  { %v367_v13 = vmul.f32 0.0625, %v351_v35  ;;  %v359_v29 = vmul.f32 0.0625, %v343_v61  ;;  %v421_v45 = vmul.f32 %v1348_v41, %v1228_v24  ;;  %v405_v34 = vmul.f32 %v1348_v41, %v1225_v9 }
 0x16b   :  { %474 = vrot.lane.b32.xlu1 %v429_v16, %s853_s25  ;;  %v751_v16 = vld [vmem:[%s1501_s2] ss:$0 sm:$0xff] }
 0x16c   :  { %v383_v31 = vadd.f32 1e-05, %v367_v13  ;;  %v375_v15 = vadd.f32 1e-05, %v359_v29  ;;  %458 = vrot.lane.b32.xlu0 %v421_v45, %s853_s25 }
 0x16e   :  { %849 = vrsqrt.f32 %v383_v31 }
 0x16f   :  { %851 = vrsqrt.f32 %v375_v15 }
 0x170   :  { %v846_v0 = vpop.eup %845 }
 0x171   :  { %v848_v11 = vpop.eup %847  ;;  %v430_v18 = vmul.f32 %v846_v0, %v1246_v17  ;;  %v400_v17 = vmul.f32 %v1296_v47, %v1099_v14  ;;  %v409_v47 = vmul.f32 %v1310_v48, %v1123_v54  ;;  %v411_v54 = vmul.f32 %v1326_v7, %v1171_v62 }
 0x172   :  { %v422_v19 = vmul.f32 %v848_v11, %v1252_v32  ;;  %v404_v62 = vmul.f32 %v1338_v37, %v1201_v38  ;;  %v414_v37 = vmul.f32 %v846_v0, %v1243_v20  ;;  %v406_v44 = vmul.f32 %v848_v11, %v1249_v39 }
 0x173   :  { %476 = vrot.lane.b32.xlu1 %v430_v18, %s853_s25 }
 0x174   :  { %460 = vrot.lane.b32.xlu0 %v422_v19, %s853_s25 }
 0x178   :  { %v1360_v12 = vpop.eup %849 }
 0x179   :  { %v1362_v24 = vpop.eup %851  ;;  %v431_v22 = vmul.f32 %v1360_v12, %v1270_v51  ;;  %v415_v9 = vmul.f32 %v1360_v12, %v1267_v50 }
 0x17a   :  { %v423_v23 = vmul.f32 %v1362_v24, %v1276_v25  ;;  %v401_v25 = vmul.f32 %v1306_v36, %v1129_v58  ;;  %v407_v61 = vmul.f32 %v1362_v24, %v1273_v28 }
 0x17b   :  { %478 = vrot.lane.b32.xlu1 %v431_v22, %s853_s25 }
 0x17c   :  { %462 = vrot.lane.b32.xlu0 %v423_v23, %s853_s25 }
 0x1b1   :  { %v449_v32 = vpop.permute.xlu0 %448 }
 0x1b2   :  { %v496_v33 = vsel %vm47_vm0, %v400_v17, %v449_v32 }
 0x1b3   :  { %790 = vmatprep.mubr.msk.f32.mxu0 %vm521_vm1, %v496_v33 }
 0x1b5   :  { %v465_v51 = vpop.permute.xlu1 %464 }
 0x1b6   :  { %v504_v30 = vsel %vm47_vm0, %v408_v5, %v465_v51 }
 0x1b7   :  { %802 = vmatprep.mubr.msk.f32.mxu1 %vm521_vm1, %v504_v30 }
 0x1bd   :  { %v451_v52 = vpop.permute.xlu1 %450 }
 0x1be   :  { %v497_v14 = vsel %vm47_vm0, %v401_v25, %v451_v52 }
 0x1bf   :  { %791 = vmatmul.mubr.msk.f32.vlgmr.msra.gmra.mrb[0].mxu0 %vm521_vm1, %v497_v14 }
 0x1c1   :  { %v467_v63 = vpop.permute.xlu1 %466 }
 0x1c2   :  { %v505_v21 = vsel %vm47_vm0, %v409_v47, %v467_v63 }
 0x1c3   :  { %803 = vmatmul.mubr.msk.f32.vlgmr.msra.gmra.mrb[0].mxu1 %vm521_vm1, %v505_v21 }
 0x1c5   :  { %v469_v58 = vpop.permute.xlu1 %468 }
 0x1c6   :  { %v453_v36 = vpop.permute.xlu0 %452  ;;  %v506_v4 = vsel %vm47_vm0, %v410_v27, %v469_v58 }
 0x1c7   :  { %v498_v53 = vsel %vm47_vm0, %v402_v57, %v453_v36  ;;  %805 = vmatprep.mubr.msk.f32.mxu1 %vm521_vm1, %v506_v4 }
 0x1c8   :  { %793 = vmatprep.mubr.msk.f32.mxu0 %vm521_vm1, %v498_v53 }
 0x1cd   :  { %v471_v48 = vpop.permute.xlu1 %470 }
 0x1ce   :  { %v507_v43 = vsel %vm47_vm0, %v411_v54, %v471_v48  ;;  %v455_v1 = vpop.permute.xlu0 %454 }
 0x1cf   :  { %v499_v6 = vsel %vm47_vm0, %v403_v26, %v455_v1  ;;  %806 = vmatmul.mubr.msk.f32.gmra.mrb[2].mxu1 %vm521_vm1, %v507_v43 }
 0x1d0   :  { %794 = vmatmul.mubr.msk.f32.gmra.mrb[2].mxu0 %vm521_vm1, %v499_v6 }
 0x1d5   :  { %v473_v2 = vpop.permute.xlu1 %472 }
 0x1d6   :  { %v508_v7 = vsel %vm47_vm0, %v412_v42, %v473_v2  ;;  %v457_v46 = vpop.permute.xlu0 %456 }
 0x1d7   :  { %v500_v3 = vsel %vm47_vm0, %v404_v62, %v457_v46  ;;  %808 = vmatprep.mubr.msk.f32.mxu1 %vm521_vm1, %v508_v7 }
 0x1d8   :  { %796 = vmatprep.mubr.msk.f32.mxu0 %vm521_vm1, %v500_v3 }
 0x1dd   :  { %v475_v59 = vpop.permute.xlu1 %474 }
 0x1de   :  { %v509_v49 = vsel %vm47_vm0, %v413_v10, %v475_v59  ;;  %v459_v40 = vpop.permute.xlu0 %458 }
 0x1df   :  { %v501_v38 = vsel %vm47_vm0, %v405_v34, %v459_v40  ;;  %809 = vmatmul.mubr.msk.f32.gmra.mrb[4].mxu1 %vm521_vm1, %v509_v49 }
 0x1e0   :  { %797 = vmatmul.mubr.msk.f32.gmra.mrb[4].mxu0 %vm521_vm1, %v501_v38 }
 0x1e5   :  { %v477_v56 = vpop.permute.xlu1 %476 }
 0x1e6   :  { %v510_v8 = vsel %vm47_vm0, %v414_v37, %v477_v56  ;;  %v461_v60 = vpop.permute.xlu0 %460 }
 0x1e7   :  { %v502_v55 = vsel %vm47_vm0, %v406_v44, %v461_v60  ;;  %811 = vmatprep.mubr.msk.f32.mxu1 %vm521_vm1, %v510_v8 }
 0x1e8   :  { %799 = vmatprep.mubr.msk.f32.mxu0 %vm521_vm1, %v502_v55 }
 0x1ed   :  { %v479_v35 = vpop.permute.xlu1 %478 }
 0x1ee   :  { %v511_v20 = vsel %vm47_vm0, %v415_v9, %v479_v35  ;;  %v463_v41 = vpop.permute.xlu0 %462 }
 0x1ef   :  { %v503_v39 = vsel %vm47_vm0, %v407_v61, %v463_v41  ;;  %812 = vmatmul.mubr.msk.f32.gmra.mrb[6].mxu1 %vm521_vm1, %v511_v20 }
 0x1f0   :  { %800 = vmatmul.mubr.msk.f32.gmra.mrb[6].mxu0 %vm521_vm1, %v503_v39 }
 0x292   :  { %v792_v13 = vpop.f32.mrb[0].mxu0 }
 0x293   :  { %v642_v29 = vadd.f32 %v792_v13, %v751_v16  ;;  %v636_v50 = vpop.f32.mrb[1].mxu0 }
 0x294   :  { %v637_v45 = vadd.f32 %v751_v16, %v636_v50 }
 0x295   :  { %716 = vst.msk [vmem:[%s1502_s3 + $0x8] sm:$0xff] %vm47_vm0, %v642_v29 }
 0x296   :  { %715 = vst.msk [vmem:[%s1502_s3] sm:$0xff] %vm47_vm0, %v637_v45  ;;  %v804_v28 = vpop.f32.mrb[0].mxu1 }
 0x297   :  { %v682_v31 = vadd.f32 %v804_v28, %v751_v16  ;;  %v676_v15 = vpop.f32.mrb[1].mxu1 }
 0x298   :  { %v677_v0 = vadd.f32 %v751_v16, %v676_v15 }
 0x299   :  { %724 = vst.msk [vmem:[%s1502_s3 + $0x48] sm:$0xff] %vm47_vm0, %v682_v31 }
 0x29a   :  { %723 = vst.msk [vmem:[%s1502_s3 + $0x40] sm:$0xff] %vm47_vm0, %v677_v0 }
 0x2a2   :  { %v807_v11 = vpop.f32.mrb[2].mxu1 }
 0x2a3   :  { %v795_v18 = vpop.f32.mrb[2].mxu0  ;;  %v692_v19 = vadd.f32 %v807_v11, %v751_v16  ;;  %v686_v12 = vpop.f32.mrb[3].mxu1 }
 0x2a4   :  { %v652_v24 = vadd.f32 %v795_v18, %v751_v16  ;;  %v646_v22 = vpop.f32.mrb[3].mxu0  ;;  %v687_v23 = vadd.f32 %v751_v16, %v686_v12 }
 0x2a5   :  { %726 = vst.msk [vmem:[%s1502_s3 + $0x58] sm:$0xff] %vm47_vm0, %v692_v19  ;;  %v647_v17 = vadd.f32 %v751_v16, %v646_v22 }
 0x2a6   :  { %718 = vst.msk [vmem:[%s1502_s3 + $0x18] sm:$0xff] %vm47_vm0, %v652_v24  ;;  %725 = vst.msk [vmem:[%s1502_s3 + $0x50] sm:$0xff] %vm47_vm0, %v687_v23 }
 0x2a7   :  { %717 = vst.msk [vmem:[%s1502_s3 + $0x10] sm:$0xff] %vm47_vm0, %v647_v17 }
 0x2b2   :  { %v810_v32 = vpop.f32.mrb[4].mxu1 }
 0x2b3   :  { %v798_v33 = vpop.f32.mrb[4].mxu0  ;;  %v702_v5 = vadd.f32 %v810_v32, %v751_v16  ;;  %v696_v51 = vpop.f32.mrb[5].mxu1 }
 0x2b4   :  { %v662_v30 = vadd.f32 %v798_v33, %v751_v16  ;;  %v656_v25 = vpop.f32.mrb[5].mxu0  ;;  %v697_v52 = vadd.f32 %v751_v16, %v696_v51 }
 0x2b5   :  { %728 = vst.msk [vmem:[%s1502_s3 + $0x68] sm:$0xff] %vm47_vm0, %v702_v5  ;;  %v657_v14 = vadd.f32 %v751_v16, %v656_v25 }
 0x2b6   :  { %720 = vst.msk [vmem:[%s1502_s3 + $0x28] sm:$0xff] %vm47_vm0, %v662_v30  ;;  %727 = vst.msk [vmem:[%s1502_s3 + $0x60] sm:$0xff] %vm47_vm0, %v697_v52 }
 0x2b7   :  { %719 = vst.msk [vmem:[%s1502_s3 + $0x20] sm:$0xff] %vm47_vm0, %v657_v14 }
 0x2c2   :  { %v813_v47 = vpop.f32.mrb[6].mxu1 }
 0x2c3   :  { %v801_v63 = vpop.f32.mrb[6].mxu0  ;;  %v712_v21 = vadd.f32 %v813_v47, %v751_v16  ;;  %v706_v27 = vpop.f32.mrb[7].mxu1 }
 0x2c4   :  { %v672_v57 = vadd.f32 %v801_v63, %v751_v16  ;;  %v666_v58 = vpop.f32.mrb[7].mxu0  ;;  %v707_v36 = vadd.f32 %v751_v16, %v706_v27 }
 0x2c5   :  { %730 = vst.msk [vmem:[%s1502_s3 + $0x78] sm:$0xff] %vm47_vm0, %v712_v21  ;;  %v667_v4 = vadd.f32 %v751_v16, %v666_v58 }
 0x2c6   :  { %722 = vst.msk [vmem:[%s1502_s3 + $0x38] sm:$0xff] %vm47_vm0, %v672_v57  ;;  %729 = vst.msk [vmem:[%s1502_s3 + $0x70] sm:$0xff] %vm47_vm0, %v707_v36 }
 0x2c7   :  { %721 = vst.msk [vmem:[%s1502_s3 + $0x30] sm:$0xff] %vm47_vm0, %v667_v4 }

</bundles_post_ra>
